<compile_context>
chip_gen: v5e
topology: v5e:2x2
jax: 0.10.0
libtpu: 0.0.40
codegen_flags: <defaults>
</compile_context>

<pallas_src>
import functools

import jax
import jax.numpy as jnp
import numpy as np
from jax.experimental import pallas as pl
from jax.experimental.pallas import tpu as pltpu


# ----------------------------------------------------------------------------
# Pallas kernel: whole BasicBlock for one lane-packed image group
# ----------------------------------------------------------------------------
def _basic_block_kernel(x_ref, w1_ref, b1_ref, w2_ref, b2_ref, out_ref,
                        pad_scr):
    """Fused conv3x3+BN1+ReLU -> conv3x3+BN2 -> +identity -> ReLU.

    x_ref   : (1, H, L) f32   lane-packed input rows (L = G*W*C, 128 here)
    w1_ref  : (3, L, L)       block-diag banded conv1 weights (BN1 scale + kw folded)
    b1_ref  : (1, L)   f32    BN1 shift, tiled across W and packed images
    w2_ref  : (3, L, L)       block-diag banded conv2 weights (BN2 scale + kw folded)
    b2_ref  : (1, L)   f32    BN2 shift
    out_ref : (1, H, L) f32
    pad_scr : (H+2, L) cdt    H-zero-padded staging buffer (reused for conv1
                              input and conv1 output; data never touches HBM)
    """
    H = x_ref.shape[1]
    L = x_ref.shape[2]
    cdt = pad_scr.dtype                      # MXU operand dtype (f32 or bf16)

    # Zero ONLY the two halo rows (rows 1..H are fully overwritten below).
    pad_scr[0:1, :] = jnp.zeros((1, L), cdt)
    pad_scr[H + 1:H + 2, :] = jnp.zeros((1, L), cdt)

    x = x_ref[0]                             # (H, L); also the residual

    # ---- conv1 (BN1 scale folded) : 3 matmuls, one per kh tap ---------------
    pad_scr[1:H + 1, :] = x.astype(cdt)
    acc = jnp.dot(pad_scr[0:H, :], w1_ref[0],
                  preferred_element_type=jnp.float32)
    acc = acc + jnp.dot(pad_scr[1:H + 1, :], w1_ref[1],
                        preferred_element_type=jnp.float32)
    acc = acc + jnp.dot(pad_scr[2:H + 2, :], w1_ref[2],
                        preferred_element_type=jnp.float32)
    h1 = jnp.maximum(acc + b1_ref[...], 0.0)      # BN1 shift + ReLU (f32)

    # ---- conv2 (BN2 scale folded) + shift + identity + ReLU -----------------
    pad_scr[1:H + 1, :] = h1.astype(cdt)          # halos are already zero
    acc2 = jnp.dot(pad_scr[0:H, :], w2_ref[0],
                   preferred_element_type=jnp.float32)
    acc2 = acc2 + jnp.dot(pad_scr[1:H + 1, :], w2_ref[1],
                          preferred_element_type=jnp.float32)
    acc2 = acc2 + jnp.dot(pad_scr[2:H + 2, :], w2_ref[2],
                          preferred_element_type=jnp.float32)
    out_ref[0] = jnp.maximum(acc2 + b2_ref[...] + x, 0.0).astype(out_ref.dtype)


# ----------------------------------------------------------------------------
# Wrapper helpers
# ----------------------------------------------------------------------------
def _banded_conv_weights(w_hwio, width, groups):
    """(3,3,Cin,Cout) HWIO weights -> (3, G*W*Cin, G*W*Cout) banded, block-diag.

    Per kh: band[j*Cin+ci, w*Cout+co] = w_hwio[kh, kw, ci, co] with j = w+kw-1
    (out-of-range j dropped == W-side zero padding).  Then the band is repeated
    block-diagonally `groups` times so images packed along the lane axis never
    mix.  With xrow[r] the lane-packed (G*W*Cin,) padded input row r, the
    stride-1 / pad-1 conv output row h is  sum_kh  xrow[h + kh] @ mats[kh].
    """
    KH, KW, Cin, Cout = w_hwio.shape
    eye_g = jnp.eye(groups, dtype=w_hwio.dtype)
    mats = []
    for kh in range(KH):
        m = jnp.zeros((width * Cin, width * Cout), w_hwio.dtype)
        for kw in range(KW):
            # sel[w, j] = 1 iff j == w + kw - 1 (out-of-range rows stay zero)
            sel = jnp.eye(width, width, k=kw - (KW // 2), dtype=w_hwio.dtype)
            m = m + jnp.einsum("wj,ic->jiwc", sel, w_hwio[kh, kw]).reshape(
                width * Cin, width * Cout)
        mats.append(jnp.kron(eye_g, m))           # block-diag across packed imgs
    return jnp.stack(mats, axis=0)


def _fused_block_call(x_pack, w1b, b1t, w2b, b2t, compute_dtype):
    P, H, L = x_pack.shape
    return pl.pallas_call(
        _basic_block_kernel,
        out_shape=jax.ShapeDtypeStruct((P, H, L), jnp.float32),
        grid=(P,),
        in_specs=[
            pl.BlockSpec((1, H, L), lambda p: (p, 0, 0)),
            pl.BlockSpec((3, L, L), lambda p: (0, 0, 0)),
            pl.BlockSpec((1, L), lambda p: (0, 0)),
            pl.BlockSpec((3, L, L), lambda p: (0, 0, 0)),
            pl.BlockSpec((1, L), lambda p: (0, 0)),
        ],
        out_specs=pl.BlockSpec((1, H, L), lambda p: (p, 0, 0)),
        scratch_shapes=[pltpu.VMEM((H + 2, L), compute_dtype)],
        compiler_params=pltpu.CompilerParams(
            dimension_semantics=("parallel",)),
    )(x_pack, w1b, b1t, w2b, b2t)


@functools.partial(jax.jit, static_argnames=("compute_dtype",))
def basic_block_forward(x_nchw, params, compute_dtype=jnp.float32):
    """BasicBlock(inplanes=C, planes=C, stride=1, downsample=None), eval BN.

    Set compute_dtype=jnp.bfloat16 for bf16 MXU operands (f32 accumulation,
    f32 epilogue) on real workloads; relax the correctness tolerance.
    """
    eps = 1e-5
    N, C, H, W = x_nchw.shape
    wc = W * C

    # Pack G images side-by-side along the lane axis so the lane width is a
    # full 128 (unmasked stores, full MXU lane utilization, G images per dot).
    G = 128 // wc if (wc < 128 and 128 % wc == 0) else 1
    Np = ((N + G - 1) // G) * G
    P = Np // G
    L = G * wc

    # NCHW -> NHWC -> (N, H, W*C), then pack G images per lane row.
    x = jnp.transpose(x_nchw, (0, 2, 3, 1)).astype(jnp.float32)
    x_flat = x.reshape(N, H, wc)
    if Np != N:
        x_flat = jnp.pad(x_flat, ((0, Np - N), (0, 0), (0, 0)))
    x_pack = x_flat.reshape(P, G, H, wc).transpose(0, 2, 1, 3).reshape(P, H, L)

    # Fold BN (eval mode) into per-channel scale (into weights) + shift.
    s1 = params["bn1_gamma"] / jnp.sqrt(params["bn1_var"] + eps)
    b1 = params["bn1_beta"] - params["bn1_mean"] * s1
    s2 = params["bn2_gamma"] / jnp.sqrt(params["bn2_var"] + eps)
    b2 = params["bn2_beta"] - params["bn2_mean"] * s2

    # Conv weights: OIHW -> HWIO, BN scale folded in, banded block-diag form.
    w1 = jnp.transpose(params["conv1_w"], (2, 3, 1, 0)) * s1[None, None, None, :]
    w2 = jnp.transpose(params["conv2_w"], (2, 3, 1, 0)) * s2[None, None, None, :]
    w1b = _banded_conv_weights(w1, W, G).astype(compute_dtype)
    w2b = _banded_conv_weights(w2, W, G).astype(compute_dtype)

    # Per-channel shifts, tiled across W and packed images (stay f32).
    b1t = jnp.tile(b1, W * G).reshape(1, L)
    b2t = jnp.tile(b2, W * G).reshape(1, L)

    out_pack = _fused_block_call(x_pack, w1b, b1t, w2b, b2t, compute_dtype)

    out = (out_pack.reshape(P, H, G, wc).transpose(0, 2, 1, 3)
           .reshape(Np, H, W, C)[:N])
    return jnp.transpose(out, (0, 3, 1, 2))                       # NHWC -> NCHW


# ----------------------------------------------------------------------------
# Pure-JAX reference (for correctness check)
# ----------------------------------------------------------------------------
def basic_block_reference(x_nchw, params):
    eps = 1e-5
    x = jnp.transpose(x_nchw, (0, 2, 3, 1)).astype(jnp.float32)
    w1 = jnp.transpose(params["conv1_w"], (2, 3, 1, 0))
    w2 = jnp.transpose(params["conv2_w"], (2, 3, 1, 0))
    dn = ("NHWC", "HWIO", "NHWC")

    def conv(v, w):
        return jax.lax.conv_general_dilated(v, w, (1, 1), ((1, 1), (1, 1)),
                                            dimension_numbers=dn)

    def bn(v, g, b, m, var):
        return (v - m) / jnp.sqrt(var + eps) * g + b

    out = conv(x, w1)
    out = bn(out, params["bn1_gamma"], params["bn1_beta"],
             params["bn1_mean"], params["bn1_var"])
    out = jnp.maximum(out, 0.0)
    out = conv(out, w2)
    out = bn(out, params["bn2_gamma"], params["bn2_beta"],
             params["bn2_mean"], params["bn2_var"])
    out = jnp.maximum(out + x, 0.0)
    return jnp.transpose(out, (0, 3, 1, 2))


# ----------------------------------------------------------------------------
if __name__ == "__main__":
    N, C, Hs, Ws = 2, 4, 16, 16  # inplanes == planes == 4, stride=1, no downsample

    key = jax.random.PRNGKey(0)
    k_x, k_w1, k_w2, k_m1, k_m2, k_v1, k_v2, k_g1, k_g2 = jax.random.split(key, 9)

    x = jax.random.normal(k_x, (N, C, Hs, Ws), jnp.float32)

    params = {
        # conv weights in PyTorch OIHW layout: (planes, inplanes, 3, 3)
        "conv1_w": 0.1 * jax.random.normal(k_w1, (C, C, 3, 3), jnp.float32),
        "conv2_w": 0.1 * jax.random.normal(k_w2, (C, C, 3, 3), jnp.float32),
        # BatchNorm2d(planes) parameters + running stats (inference semantics)
        "bn1_gamma": 1.0 + 0.1 * jax.random.normal(k_g1, (C,), jnp.float32),
        "bn1_beta": jnp.linspace(-0.1, 0.1, C, dtype=jnp.float32),
        "bn1_mean": 0.1 * jax.random.normal(k_m1, (C,), jnp.float32),
        "bn1_var": 1.0 + 0.1 * jnp.abs(jax.random.normal(k_v1, (C,), jnp.float32)),
        "bn2_gamma": 1.0 + 0.1 * jax.random.normal(k_g2, (C,), jnp.float32),
        "bn2_beta": jnp.linspace(0.1, -0.1, C, dtype=jnp.float32),
        "bn2_mean": 0.1 * jax.random.normal(k_m2, (C,), jnp.float32),
        "bn2_var": 1.0 + 0.1 * jnp.abs(jax.random.normal(k_v2, (C,), jnp.float32)),
    }

    # f32 operand path keeps the 1e-4 check tight; use compute_dtype=bf16 for
    # MXU-native operands on real sizes (relax tolerance accordingly).
    out = basic_block_forward(x, params)
    out = jax.block_until_ready(out)

    ref = jax.block_until_ready(basic_block_reference(x, params))
    assert out.shape == (N, C, Hs, Ws), out.shape
    np.testing.assert_allclose(np.asarray(out), np.asarray(ref),
                               rtol=1e-4, atol=1e-4)

    print("KERNEL_OK")
</pallas_src>

<mosaic_0001>
module attributes {stable_mosaic.version = 11 : i64} {
  func.func @_basic_block_kernel(%arg0: i32, %arg1: memref<1x16x128xf32, #tpu.memory_space<vmem>>, %arg2: memref<3x128x128xf32, #tpu.memory_space<vmem>>, %arg3: memref<1x128xf32, #tpu.memory_space<vmem>>, %arg4: memref<3x128x128xf32, #tpu.memory_space<vmem>>, %arg5: memref<1x128xf32, #tpu.memory_space<vmem>>, %arg6: memref<1x16x128xf32, #tpu.memory_space<vmem>>, %arg7: memref<18x128xf32, #tpu.memory_space<vmem>>) attributes {dimension_semantics = [#tpu.dimension_semantics<parallel>], iteration_bounds = array<i64: 1>, scalar_prefetch = 0 : i64, scratch_operands = 1 : i64, tpu.core_type = #tpu.core_type<tc>, window_params = [{transform_indices = @transform_0, window_bounds = array<i64: 1, 16, 128>}, {pipeline_mode = #tpu.pipeline_mode<synchronous>, transform_indices = @transform_1, window_bounds = array<i64: 3, 128, 128>}, {pipeline_mode = #tpu.pipeline_mode<synchronous>, transform_indices = @transform_2, window_bounds = array<i64: 1, 128>}, {pipeline_mode = #tpu.pipeline_mode<synchronous>, transform_indices = @transform_3, window_bounds = array<i64: 3, 128, 128>}, {pipeline_mode = #tpu.pipeline_mode<synchronous>, transform_indices = @transform_4, window_bounds = array<i64: 1, 128>}, {transform_indices = @transform_5, window_bounds = array<i64: 1, 16, 128>}]} {
    %cst = arith.constant 0.000000e+00 : f32
    %0 = vector.broadcast %cst : f32 to vector<1x128xf32>
    %c0 = arith.constant 0 : index
    %c0_0 = arith.constant 0 : index
    %1 = vector.load %arg7[%c0, %c0_0] : memref<18x128xf32, #tpu.memory_space<vmem>>, vector<1x128xf32>
    tpu.vector_store %arg7[%c0, %c0_0], %0 {strides = array<i32>} : memref<18x128xf32, #tpu.memory_space<vmem>>, vector<1x128xf32>,
    %cst_1 = arith.constant 0.000000e+00 : f32
    %2 = vector.broadcast %cst_1 : f32 to vector<1x128xf32>
    %c17 = arith.constant 17 : index
    %c0_2 = arith.constant 0 : index
    %3 = vector.load %arg7[%c17, %c0_2] : memref<18x128xf32, #tpu.memory_space<vmem>>, vector<1x128xf32>
    tpu.vector_store %arg7[%c17, %c0_2], %2 {strides = array<i32>} : memref<18x128xf32, #tpu.memory_space<vmem>>, vector<1x128xf32>,
    %c0_3 = arith.constant 0 : index
    %c0_4 = arith.constant 0 : index
    %c0_5 = arith.constant 0 : index
    %4 = vector.load %arg1[%c0_3, %c0_4, %c0_5] : memref<1x16x128xf32, #tpu.memory_space<vmem>>, vector<1x16x128xf32>
    %5 = vector.shape_cast %4 : vector<1x16x128xf32> to vector<16x128xf32>
    %c1 = arith.constant 1 : index
    %c0_6 = arith.constant 0 : index
    %6 = vector.load %arg7[%c1, %c0_6] : memref<18x128xf32, #tpu.memory_space<vmem>>, vector<16x128xf32>
    tpu.vector_store %arg7[%c1, %c0_6], %5 {strides = array<i32>} : memref<18x128xf32, #tpu.memory_space<vmem>>, vector<16x128xf32>,
    %c0_7 = arith.constant 0 : index
    %c0_8 = arith.constant 0 : index
    %7 = vector.load %arg7[%c0_7, %c0_8] : memref<18x128xf32, #tpu.memory_space<vmem>>, vector<16x128xf32>
    %c0_9 = arith.constant 0 : index
    %c0_10 = arith.constant 0 : index
    %c0_11 = arith.constant 0 : index
    %8 = vector.load %arg2[%c0_9, %c0_10, %c0_11] : memref<3x128x128xf32, #tpu.memory_space<vmem>>, vector<1x128x128xf32>
    %9 = vector.shape_cast %8 : vector<1x128x128xf32> to vector<128x128xf32>
    %cst_12 = arith.constant dense<0.000000e+00> : vector<16x128xf32>
    %10 = tpu.matmul %7, %9, %cst_12 {dimension_numbers = #tpu.dot_dimension_numbers<[1], [0], [0], [1], [0, 0, 1, 1], [], []>} : vector<16x128xf32>, vector<128x128xf32>, vector<16x128xf32> -> vector<16x128xf32>
    %c1_13 = arith.constant 1 : index
    %c0_14 = arith.constant 0 : index
    %11 = vector.load %arg7[%c1_13, %c0_14] : memref<18x128xf32, #tpu.memory_space<vmem>>, vector<16x128xf32>
    %c1_15 = arith.constant 1 : index
    %c0_16 = arith.constant 0 : index
    %c0_17 = arith.constant 0 : index
    %12 = vector.load %arg2[%c1_15, %c0_16, %c0_17] : memref<3x128x128xf32, #tpu.memory_space<vmem>>, vector<1x128x128xf32>
    %13 = vector.shape_cast %12 : vector<1x128x128xf32> to vector<128x128xf32>
    %cst_18 = arith.constant dense<0.000000e+00> : vector<16x128xf32>
    %14 = tpu.matmul %11, %13, %cst_18 {dimension_numbers = #tpu.dot_dimension_numbers<[1], [0], [0], [1], [0, 0, 1, 1], [], []>} : vector<16x128xf32>, vector<128x128xf32>, vector<16x128xf32> -> vector<16x128xf32>
    %15 = arith.addf %10, %14 : vector<16x128xf32>
    %c2 = arith.constant 2 : index
    %c0_19 = arith.constant 0 : index
    %16 = vector.load %arg7[%c2, %c0_19] : memref<18x128xf32, #tpu.memory_space<vmem>>, vector<16x128xf32>
    %c2_20 = arith.constant 2 : index
    %c0_21 = arith.constant 0 : index
    %c0_22 = arith.constant 0 : index
    %17 = vector.load %arg2[%c2_20, %c0_21, %c0_22] : memref<3x128x128xf32, #tpu.memory_space<vmem>>, vector<1x128x128xf32>
    %18 = vector.shape_cast %17 : vector<1x128x128xf32> to vector<128x128xf32>
    %cst_23 = arith.constant dense<0.000000e+00> : vector<16x128xf32>
    %19 = tpu.matmul %16, %18, %cst_23 {dimension_numbers = #tpu.dot_dimension_numbers<[1], [0], [0], [1], [0, 0, 1, 1], [], []>} : vector<16x128xf32>, vector<128x128xf32>, vector<16x128xf32> -> vector<16x128xf32>
    %20 = arith.addf %15, %19 : vector<16x128xf32>
    %c0_24 = arith.constant 0 : index
    %c0_25 = arith.constant 0 : index
    %21 = vector.load %arg3[%c0_24, %c0_25] : memref<1x128xf32, #tpu.memory_space<vmem>>, vector<1x128xf32>
    %22 = vector.broadcast %21 : vector<1x128xf32> to vector<16x128xf32>
    %23 = arith.addf %20, %22 : vector<16x128xf32>
    %cst_26 = arith.constant 0.000000e+00 : f32
    %24 = vector.broadcast %cst_26 : f32 to vector<16x128xf32>
    %25 = arith.maximumf %23, %24 : vector<16x128xf32>
    %c1_27 = arith.constant 1 : index
    %c0_28 = arith.constant 0 : index
    %26 = vector.load %arg7[%c1_27, %c0_28] : memref<18x128xf32, #tpu.memory_space<vmem>>, vector<16x128xf32>
    tpu.vector_store %arg7[%c1_27, %c0_28], %25 {strides = array<i32>} : memref<18x128xf32, #tpu.memory_space<vmem>>, vector<16x128xf32>,
    %c0_29 = arith.constant 0 : index
    %c0_30 = arith.constant 0 : index
    %27 = vector.load %arg7[%c0_29, %c0_30] : memref<18x128xf32, #tpu.memory_space<vmem>>, vector<16x128xf32>
    %c0_31 = arith.constant 0 : index
    %c0_32 = arith.constant 0 : index
    %c0_33 = arith.constant 0 : index
    %28 = vector.load %arg4[%c0_31, %c0_32, %c0_33] : memref<3x128x128xf32, #tpu.memory_space<vmem>>, vector<1x128x128xf32>
    %29 = vector.shape_cast %28 : vector<1x128x128xf32> to vector<128x128xf32>
    %cst_34 = arith.constant dense<0.000000e+00> : vector<16x128xf32>
    %30 = tpu.matmul %27, %29, %cst_34 {dimension_numbers = #tpu.dot_dimension_numbers<[1], [0], [0], [1], [0, 0, 1, 1], [], []>} : vector<16x128xf32>, vector<128x128xf32>, vector<16x128xf32> -> vector<16x128xf32>
    %c1_35 = arith.constant 1 : index
    %c0_36 = arith.constant 0 : index
    %31 = vector.load %arg7[%c1_35, %c0_36] : memref<18x128xf32, #tpu.memory_space<vmem>>, vector<16x128xf32>
    %c1_37 = arith.constant 1 : index
    %c0_38 = arith.constant 0 : index
    %c0_39 = arith.constant 0 : index
    %32 = vector.load %arg4[%c1_37, %c0_38, %c0_39] : memref<3x128x128xf32, #tpu.memory_space<vmem>>, vector<1x128x128xf32>
    %33 = vector.shape_cast %32 : vector<1x128x128xf32> to vector<128x128xf32>
    %cst_40 = arith.constant dense<0.000000e+00> : vector<16x128xf32>
    %34 = tpu.matmul %31, %33, %cst_40 {dimension_numbers = #tpu.dot_dimension_numbers<[1], [0], [0], [1], [0, 0, 1, 1], [], []>} : vector<16x128xf32>, vector<128x128xf32>, vector<16x128xf32> -> vector<16x128xf32>
    %35 = arith.addf %30, %34 : vector<16x128xf32>
    %c2_41 = arith.constant 2 : index
    %c0_42 = arith.constant 0 : index
    %36 = vector.load %arg7[%c2_41, %c0_42] : memref<18x128xf32, #tpu.memory_space<vmem>>, vector<16x128xf32>
    %c2_43 = arith.constant 2 : index
    %c0_44 = arith.constant 0 : index
    %c0_45 = arith.constant 0 : index
    %37 = vector.load %arg4[%c2_43, %c0_44, %c0_45] : memref<3x128x128xf32, #tpu.memory_space<vmem>>, vector<1x128x128xf32>
    %38 = vector.shape_cast %37 : vector<1x128x128xf32> to vector<128x128xf32>
    %cst_46 = arith.constant dense<0.000000e+00> : vector<16x128xf32>
    %39 = tpu.matmul %36, %38, %cst_46 {dimension_numbers = #tpu.dot_dimension_numbers<[1], [0], [0], [1], [0, 0, 1, 1], [], []>} : vector<16x128xf32>, vector<128x128xf32>, vector<16x128xf32> -> vector<16x128xf32>
    %40 = arith.addf %35, %39 : vector<16x128xf32>
    %c0_47 = arith.constant 0 : index
    %c0_48 = arith.constant 0 : index
    %41 = vector.load %arg5[%c0_47, %c0_48] : memref<1x128xf32, #tpu.memory_space<vmem>>, vector<1x128xf32>
    %42 = vector.broadcast %41 : vector<1x128xf32> to vector<16x128xf32>
    %43 = arith.addf %40, %42 : vector<16x128xf32>
    %44 = arith.addf %43, %5 : vector<16x128xf32>
    %cst_49 = arith.constant 0.000000e+00 : f32
    %45 = vector.broadcast %cst_49 : f32 to vector<16x128xf32>
    %46 = arith.maximumf %44, %45 : vector<16x128xf32>
    %c0_50 = arith.constant 0 : index
    %c0_51 = arith.constant 0 : index
    %c0_52 = arith.constant 0 : index
    %47 = vector.load %arg6[%c0_50, %c0_51, %c0_52] : memref<1x16x128xf32, #tpu.memory_space<vmem>>, vector<1x16x128xf32>
    %48 = vector.shape_cast %47 : vector<1x16x128xf32> to vector<16x128xf32>
    %49 = vector.shape_cast %46 : vector<16x128xf32> to vector<1x16x128xf32>
    tpu.vector_store %arg6[%c0_50, %c0_51, %c0_52], %49 {strides = array<i32>} : memref<1x16x128xf32, #tpu.memory_space<vmem>>, vector<1x16x128xf32>,
    return
  }
  func.func @transform_0(%arg0: i32) -> (i32, i32, i32) {
    %c0_i32 = arith.constant 0 : i32
    %c0_i32_0 = arith.constant 0 : i32
    %c0_i32_1 = arith.constant 0 : i32
    return %arg0, %c0_i32, %c0_i32_0 : i32, i32, i32
  }
  func.func @transform_1(%arg0: i32) -> (i32, i32, i32) {
    %c0_i32 = arith.constant 0 : i32
    %c0_i32_0 = arith.constant 0 : i32
    %c0_i32_1 = arith.constant 0 : i32
    %c0_i32_2 = arith.constant 0 : i32
    return %c0_i32, %c0_i32_0, %c0_i32_1 : i32, i32, i32
  }
  func.func @transform_2(%arg0: i32) -> (i32, i32) {
    %c0_i32 = arith.constant 0 : i32
    %c0_i32_0 = arith.constant 0 : i32
    %c0_i32_1 = arith.constant 0 : i32
    return %c0_i32, %c0_i32_0 : i32, i32
  }
  func.func @transform_3(%arg0: i32) -> (i32, i32, i32) {
    %c0_i32 = arith.constant 0 : i32
    %c0_i32_0 = arith.constant 0 : i32
    %c0_i32_1 = arith.constant 0 : i32
    %c0_i32_2 = arith.constant 0 : i32
    return %c0_i32, %c0_i32_0, %c0_i32_1 : i32, i32, i32
  }
  func.func @transform_4(%arg0: i32) -> (i32, i32) {
    %c0_i32 = arith.constant 0 : i32
    %c0_i32_0 = arith.constant 0 : i32
    %c0_i32_1 = arith.constant 0 : i32
    return %c0_i32, %c0_i32_0 : i32, i32
  }
  func.func @transform_5(%arg0: i32) -> (i32, i32, i32) {
    %c0_i32 = arith.constant 0 : i32
    %c0_i32_0 = arith.constant 0 : i32
    %c0_i32_1 = arith.constant 0 : i32
    return %arg0, %c0_i32, %c0_i32_0 : i32, i32, i32
  }
}

</mosaic_0001>

<bundles_post_ra>
// kernel: tile.13
= control target key start
LH: loop header
LB: loop body
LE: loop exit
PB: predicated region body
PF: predicated region fallthrough
CT: control target
= control target key end

     0   :  { %s40_s0 = inlined_call_operand.vmem [shape: f32[4], index: 0, kind: input, shape index: {}]   ;;  %s41_s1 = inlined_call_operand.vmem [shape: f32[32,4], index: 1, kind: output, shape index: {}]  }
   0x1   :  { %v4_v0 = vld [vmem:[%s40_s0] ss:$0 sm:$0xff] }
   0x2   :  { %5 = vst [vmem:[%s41_s1] sm:$0xff] %v4_v0 }
   0x3   :  { %12 = vst [vmem:[%s41_s1 + $0x8] sm:$0xff] %v4_v0 }
   0x4   :  { %13 = vst [vmem:[%s41_s1 + $0x10] sm:$0xff] %v4_v0 }
   0x5   :  { %14 = vst [vmem:[%s41_s1 + $0x18] sm:$0xff] %v4_v0 }

// kernel: tile.14
= control target key start
LH: loop header
LB: loop body
LE: loop exit
PB: predicated region body
PF: predicated region fallthrough
CT: control target
= control target key end

     0   :  { %s259_s10 = smov 124   ;;  %s260_s11 = smov 116   ;;  %vm3_vm0 = vcmask 31744   ;;  %vm9_vm1 = vcmask 1048544   ;;  %vm15_vm2 = vcmask 1015744   ;;  %vm21_vm3 = vcmask 982944   ;;  %s399_s0 = inlined_call_operand.vmem [shape: f32[32,4], index: 0, kind: input, shape index: {}]   ;;  %s400_s1 = inlined_call_operand.vmem [shape: f32[1,128], index: 1, kind: output, shape index: {}]  }
   0x1   :  { %v197_v0 = vld [vmem:[%s399_s0 + $0x1f] sm:$0x1]   ;;  %v199_v1 = vld [vmem:[%s399_s0 + $0x1d] sm:$0x1]   ;;  %v201_v2 = vld [vmem:[%s399_s0 + $0x1b] sm:$0x1]  }
   0x2   :  { %7 = vrot.lane.b32.xlu0 %v197_v0, %s259_s10  ;;  %19 = vrot.lane.b32.xlu1 %v199_v1, %s260_s11  ;;  %s261_s14 = smov 108   ;;  %v198_v3 = vld [vmem:[%s399_s0 + $0x1e] sm:$0x1]   ;;  %v200_v4 = vld [vmem:[%s399_s0 + $0x1c] sm:$0x1]   ;;  %s262_s19 = smov 120  }
   0x3   :  { %31 = vrot.lane.b32.xlu2 %v201_v2, %s261_s14  ;;  %s263_s20 = smov 112   ;;  %v202_v5 = vld [vmem:[%s399_s0 + $0x1a] sm:$0x1]   ;;  %s264_s23 = smov 104   ;;  %v203_v6 = vld [vmem:[%s399_s0 + $0x19] sm:$0x1]  }
   0x4   :  { %v204_v7 = vld [vmem:[%s399_s0 + $0x18] sm:$0x1]   ;;  %s265_s28 = smov 100   ;;  %s266_s29 = smov 96   ;;  %v205_v8 = vld [vmem:[%s399_s0 + $0x17] sm:$0x1]  }
   0x5   :  { %s267_s3 = smov 92   ;;  %v206_v9 = vld [vmem:[%s399_s0 + $0x16] sm:$0x1]   ;;  %v207_v10 = vld [vmem:[%s399_s0 + $0x15] sm:$0x1]   ;;  %s268_s8 = smov 88  }
   0x6   :  { %s269_s9 = smov 84   ;;  %v208_v11 = vld [vmem:[%s399_s0 + $0x14] sm:$0x1]   ;;  %s270_s12 = smov 80   ;;  %v209_v12 = vld [vmem:[%s399_s0 + $0x13] sm:$0x1]  }
   0x7   :  { %v210_v13 = vld [vmem:[%s399_s0 + $0x12] sm:$0x1]   ;;  %s271_s17 = smov 76   ;;  %s272_s18 = smov 72   ;;  %v211_v14 = vld [vmem:[%s399_s0 + $0x11] sm:$0x1]  }
   0x8   :  { %s273_s21 = smov 68   ;;  %v212_v15 = vld [vmem:[%s399_s0 + $0x10] sm:$0x1]   ;;  %v213_v16 = vld [vmem:[%s399_s0 + $0xf] sm:$0x1]   ;;  %s274_s26 = smov 64  }
   0x9   :  { %s275_s27 = smov 60   ;;  %v214_v17 = vld [vmem:[%s399_s0 + $0xe] sm:$0x1]   ;;  %s276_s30 = smov 56   ;;  %v215_v18 = vld [vmem:[%s399_s0 + $0xd] sm:$0x1]  }
   0xa   :  { %13 = vrot.lane.b32.xlu0 %v198_v3, %s262_s19  ;;  %25 = vrot.lane.b32.xlu1 %v200_v4, %s263_s20  ;;  %v216_v19 = vld [vmem:[%s399_s0 + $0xc] sm:$0x1]   ;;  %s277_s6 = smov 52   ;;  %s278_s7 = smov 48   ;;  %v217_v20 = vld [vmem:[%s399_s0 + $0xb] sm:$0x1]  }
   0xb   :  { %37 = vrot.lane.b32.xlu2 %v202_v5, %s264_s23  ;;  %s279_s10 = smov 44   ;;  %v218_v21 = vld [vmem:[%s399_s0 + $0xa] sm:$0x1]   ;;  %v219_v22 = vld [vmem:[%s399_s0 + $0x9] sm:$0x1]   ;;  %s280_s15 = smov 40  }
   0xc   :  { %s281_s16 = smov 36   ;;  %v220_v23 = vld [vmem:[%s399_s0 + $0x8] sm:$0x1]   ;;  %s282_s19 = smov 32   ;;  %v221_v24 = vld [vmem:[%s399_s0 + $0x7] sm:$0x1]  }
   0xd   :  { %v222_v25 = vld [vmem:[%s399_s0 + $0x6] sm:$0x1]   ;;  %s283_s24 = smov 28   ;;  %s284_s25 = smov 24   ;;  %v223_v26 = vld [vmem:[%s399_s0 + $0x5] sm:$0x1]  }
   0xe   :  { %v224_v27 = vld [vmem:[%s399_s0 + $0x4] sm:$0x1]   ;;  %v225_v28 = vld [vmem:[%s399_s0 + $0x3] sm:$0x1]   ;;  %s286_s4 = smov 16   ;;  %s287_s5 = smov 12  }
   0xf   :  { %v226_v29 = vld [vmem:[%s399_s0 + $0x2] sm:$0x1]   ;;  %v227_v30 = vld [vmem:[%s399_s0 + $0x1] sm:$0x1]   ;;  %s289_s11 = smov 4   ;;  %vm27_vm4 = vcmask 950144  }
  0x10   :  { %v2_v31 = vld [vmem:[%s399_s0] sm:$0x1]   ;;  %vm33_vm5 = vcmask 917344   ;;  %vm39_vm6 = vcmask 884544   ;;  %vm45_vm7 = vcmask 851744   ;;  %vm51_vm8 = vcmask 818944  }
  0x11   :  { %4 = vst.msk [vmem:[#allocation0] sm:$0x1] %vm3_vm0, %v2_v31   ;;  %vm57_vm9 = vcmask 786144   ;;  %vm63_vm10 = vcmask 753344   ;;  %vm69_vm11 = vcmask 720544   ;;  %vm75_vm12 = vcmask 687744  }
  0x12   :  { %43 = vrot.lane.b32.xlu0 %v203_v6, %s265_s28  ;;  %49 = vrot.lane.b32.xlu1 %v204_v7, %s266_s29  ;;  %s285_s28 = smov 20   ;;  %vm81_vm13 = vcmask 654944   ;;  %vm87_vm14 = vcmask 622144   ;;  %vm93_vm15 = vcmask 589344   ;;  %vm99_vm0 = vcmask 556544  }
  0x13   :  { %55 = vrot.lane.b32.xlu2 %v205_v8, %s267_s3 }
  0x1a   :  { %61 = vrot.lane.b32.xlu0 %v206_v9, %s268_s8  ;;  %67 = vrot.lane.b32.xlu1 %v207_v10, %s269_s9  ;;  %s288_s8 = smov 8  }
  0x1b   :  { %73 = vrot.lane.b32.xlu2 %v208_v11, %s270_s12 }
  0x22   :  { %79 = vrot.lane.b32.xlu0 %v209_v12, %s271_s17  ;;  %85 = vrot.lane.b32.xlu1 %v210_v13, %s272_s18 }
  0x23   :  { %91 = vrot.lane.b32.xlu2 %v211_v14, %s273_s21 }
  0x2a   :  { %97 = vrot.lane.b32.xlu0 %v212_v15, %s274_s26  ;;  %103 = vrot.lane.b32.xlu1 %v213_v16, %s275_s27 }
  0x2b   :  { %109 = vrot.lane.b32.xlu2 %v214_v17, %s276_s30 }
  0x32   :  { %115 = vrot.lane.b32.xlu0 %v215_v18, %s277_s6  ;;  %121 = vrot.lane.b32.xlu1 %v216_v19, %s278_s7 }
  0x33   :  { %127 = vrot.lane.b32.xlu2 %v217_v20, %s279_s10 }
  0x3a   :  { %133 = vrot.lane.b32.xlu0 %v218_v21, %s280_s15  ;;  %139 = vrot.lane.b32.xlu1 %v219_v22, %s281_s16 }
  0x3b   :  { %145 = vrot.lane.b32.xlu2 %v220_v23, %s282_s19 }
  0x42   :  { %151 = vrot.lane.b32.xlu0 %v221_v24, %s283_s24  ;;  %157 = vrot.lane.b32.xlu1 %v222_v25, %s284_s25 }
  0x43   :  { %163 = vrot.lane.b32.xlu2 %v223_v26, %s285_s28 }
  0x4a   :  { %169 = vrot.lane.b32.xlu0 %v224_v27, %s286_s4  ;;  %175 = vrot.lane.b32.xlu1 %v225_v28, %s287_s5 }
  0x4b   :  { %181 = vrot.lane.b32.xlu2 %v226_v29, %s288_s8 }
  0x52   :  { %187 = vrot.lane.b32.xlu0 %v227_v30, %s289_s11 }
  0x5d   :  { %v32_v32 = vpop.permute.xlu2 %31  }
  0x65   :  { %v38_v33 = vpop.permute.xlu2 %37  }
  0x6d   :  { %v56_v34 = vpop.permute.xlu2 %55  }
  0x74   :  { %v8_v35 = vpop.permute.xlu0 %7   ;;  %v20_v36 = vpop.permute.xlu1 %19  }
  0x75   :  { %10 = vst.msk [vmem:[#allocation0] sm:$0x1] %vm9_vm1, %v8_v35   ;;  %v74_v37 = vpop.permute.xlu2 %73   ;;  %vm105_vm1 = vcmask 523744  }
  0x7c   :  { %v14_v38 = vpop.permute.xlu0 %13   ;;  %v26_v39 = vpop.permute.xlu1 %25  }
  0x7d   :  { %16 = vst.msk [vmem:[#allocation0] sm:$0x1] %vm15_vm2, %v14_v38   ;;  %v92_v40 = vpop.permute.xlu2 %91   ;;  %vm111_vm2 = vcmask 490944  }
  0x7e   :  { %22 = vst.msk [vmem:[#allocation0] sm:$0x1] %vm21_vm3, %v20_v36   ;;  %vm117_vm3 = vcmask 458144  }
  0x7f   :  { %28 = vst.msk [vmem:[#allocation0] sm:$0x1] %vm27_vm4, %v26_v39   ;;  %vm123_vm4 = vcmask 425344  }
  0x80   :  { %34 = vst.msk [vmem:[#allocation0] sm:$0x1] %vm33_vm5, %v32_v32   ;;  %vm129_vm5 = vcmask 392544  }
  0x81   :  { %40 = vst.msk [vmem:[#allocation0] sm:$0x1] %vm39_vm6, %v38_v33   ;;  %vm135_vm6 = vcmask 359744  }
  0x84   :  { %v44_v41 = vpop.permute.xlu0 %43   ;;  %v50_v42 = vpop.permute.xlu1 %49  }
  0x85   :  { %46 = vst.msk [vmem:[#allocation0] sm:$0x1] %vm45_vm7, %v44_v41   ;;  %v110_v43 = vpop.permute.xlu2 %109   ;;  %vm141_vm7 = vcmask 326944  }
  0x86   :  { %52 = vst.msk [vmem:[#allocation0] sm:$0x1] %vm51_vm8, %v50_v42   ;;  %vm147_vm8 = vcmask 294144  }
  0x87   :  { %58 = vst.msk [vmem:[#allocation0] sm:$0x1] %vm57_vm9, %v56_v34   ;;  %vm153_vm9 = vcmask 261344  }
  0x8c   :  { %v62_v44 = vpop.permute.xlu0 %61   ;;  %v68_v45 = vpop.permute.xlu1 %67  }
  0x8d   :  { %64 = vst.msk [vmem:[#allocation0] sm:$0x1] %vm63_vm10, %v62_v44   ;;  %v128_v46 = vpop.permute.xlu2 %127   ;;  %vm159_vm10 = vcmask 228544  }
  0x8e   :  { %70 = vst.msk [vmem:[#allocation0] sm:$0x1] %vm69_vm11, %v68_v45   ;;  %vm165_vm11 = vcmask 195744  }
  0x8f   :  { %76 = vst.msk [vmem:[#allocation0] sm:$0x1] %vm75_vm12, %v74_v37   ;;  %vm171_vm12 = vcmask 162944  }
  0x94   :  { %v80_v47 = vpop.permute.xlu0 %79   ;;  %v86_v48 = vpop.permute.xlu1 %85  }
  0x95   :  { %82 = vst.msk [vmem:[#allocation0] sm:$0x1] %vm81_vm13, %v80_v47   ;;  %v146_v49 = vpop.permute.xlu2 %145   ;;  %vm177_vm13 = vcmask 130144  }
  0x96   :  { %88 = vst.msk [vmem:[#allocation0] sm:$0x1] %vm87_vm14, %v86_v48   ;;  %vm183_vm14 = vcmask 97344  }
  0x97   :  { %94 = vst.msk [vmem:[#allocation0] sm:$0x1] %vm93_vm15, %v92_v40   ;;  %vm189_vm15 = vcmask 64544  }
  0x9c   :  { %v98_v50 = vpop.permute.xlu0 %97   ;;  %v104_v51 = vpop.permute.xlu1 %103  }
  0x9d   :  { %100 = vst.msk [vmem:[#allocation0] sm:$0x1] %vm99_vm0, %v98_v50   ;;  %v164_v52 = vpop.permute.xlu2 %163  }
  0x9e   :  { %106 = vst.msk [vmem:[#allocation0] sm:$0x1] %vm105_vm1, %v104_v51  }
  0x9f   :  { %112 = vst.msk [vmem:[#allocation0] sm:$0x1] %vm111_vm2, %v110_v43  }
  0xa4   :  { %v116_v53 = vpop.permute.xlu0 %115   ;;  %v122_v54 = vpop.permute.xlu1 %121  }
  0xa5   :  { %118 = vst.msk [vmem:[#allocation0] sm:$0x1] %vm117_vm3, %v116_v53   ;;  %v182_v55 = vpop.permute.xlu2 %181  }
  0xa6   :  { %124 = vst.msk [vmem:[#allocation0] sm:$0x1] %vm123_vm4, %v122_v54  }
  0xa7   :  { %130 = vst.msk [vmem:[#allocation0] sm:$0x1] %vm129_vm5, %v128_v46  }
  0xac   :  { %v134_v56 = vpop.permute.xlu0 %133   ;;  %v140_v57 = vpop.permute.xlu1 %139  }
  0xad   :  { %136 = vst.msk [vmem:[#allocation0] sm:$0x1] %vm135_vm6, %v134_v56  }
  0xae   :  { %142 = vst.msk [vmem:[#allocation0] sm:$0x1] %vm141_vm7, %v140_v57  }
  0xaf   :  { %148 = vst.msk [vmem:[#allocation0] sm:$0x1] %vm147_vm8, %v146_v49  }
  0xb4   :  { %v152_v58 = vpop.permute.xlu0 %151   ;;  %v158_v59 = vpop.permute.xlu1 %157  }
  0xb5   :  { %154 = vst.msk [vmem:[#allocation0] sm:$0x1] %vm153_vm9, %v152_v58  }
  0xb6   :  { %160 = vst.msk [vmem:[#allocation0] sm:$0x1] %vm159_vm10, %v158_v59  }
  0xb7   :  { %166 = vst.msk [vmem:[#allocation0] sm:$0x1] %vm165_vm11, %v164_v52  }
  0xbc   :  { %v170_v60 = vpop.permute.xlu0 %169   ;;  %v176_v61 = vpop.permute.xlu1 %175  }
  0xbd   :  { %172 = vst.msk [vmem:[#allocation0] sm:$0x1] %vm171_vm12, %v170_v60  }
  0xbe   :  { %178 = vst.msk [vmem:[#allocation0] sm:$0x1] %vm177_vm13, %v176_v61  }
  0xbf   :  { %184 = vst.msk [vmem:[#allocation0] sm:$0x1] %vm183_vm14, %v182_v55  }
  0xc4   :  { %v188_v62 = vpop.permute.xlu0 %187  }
  0xc5   :  { %190 = vst.msk [vmem:[#allocation0] sm:$0x1] %vm189_vm15, %v188_v62  }
  0xcc   :  { %v193_v63 = vld [vmem:[#allocation0] sm:$0x1] }
  0xcd   :  { %196 = vst [vmem:[%s400_s1] sm:$0x1] %v193_v63 }

// kernel: basic_block_forward.1
= control target key start
LH: loop header
LB: loop body
LE: loop exit
PB: predicated region body
PF: predicated region fallthrough
CT: control target
= control target key end

     0   :  { %v405_v3 = vmov 0.0   ;;  %s752_s1 = inlined_call_operand.vmem [shape: f32[3,128,128], index: 1, kind: input, shape index: {}]   ;;  %s753_s0 = inlined_call_operand.vmem [shape: f32[1,16,128], index: 0, kind: input, shape index: {}]   ;;  %s754_s3 = inlined_call_operand.vmem [shape: f32[3,128,128], index: 3, kind: input, shape index: {}]   ;;  %s755_s2 = inlined_call_operand.vmem [shape: f32[1,128], index: 2, kind: input, shape index: {}]   ;;  %s756_s4 = inlined_call_operand.vmem [shape: f32[1,128], index: 4, kind: input, shape index: {}]   ;;  %s757_s5 = inlined_call_operand.vmem [shape: f32[1,16,128], index: 5, kind: output, shape index: {}]  }
   0x1   :  { %v337_v0 = vld [vmem:[%s752_s1 + $0x178] sm:$0xff]  ;;  %v336_v1 = vld [vmem:[%s752_s1 + $0x170] sm:$0xff]  ;;  %20 = vst [vmem:[#allocation2] sm:$0x1] %v405_v3  ;;  %v335_v6 = vld [vmem:[%s752_s1 + $0x168] sm:$0xff] }
   0x2   :  { %v321_v2 = vld [vmem:[%s752_s1 + $0xf8] sm:$0xff]  ;;  %128 = vmatpush.msra.mxu2 %v337_v0  ;;  %v320_v5 = vld [vmem:[%s752_s1 + $0xf0] sm:$0xff]  ;;  %21 = vst [vmem:[#allocation2 + $0x11] sm:$0x1] %v405_v3  ;;  %v319_v8 = vld [vmem:[%s752_s1 + $0xe8] sm:$0xff] }
   0x3   :  { %63 = vmatpush.msra.mxu0 %v321_v2  ;;  %v43_v4 = vld [vmem:[%s752_s1 + $0x78] sm:$0xff]  ;;  %v42_v7 = vld [vmem:[%s752_s1 + $0x70] sm:$0xff]  ;;  %v41_v9 = vld [vmem:[%s752_s1 + $0x68] sm:$0xff] }
   0x4   :  { %86 = vmatpush.msra.mxu1 %v43_v4  ;;  %129 = vmatpush.msra.mxu2 %v336_v1  ;;  %v334_v10 = vld [vmem:[%s752_s1 + $0x160] sm:$0xff]  ;;  %v333_v13 = vld [vmem:[%s752_s1 + $0x158] sm:$0xff]  ;;  %v332_v16 = vld [vmem:[%s752_s1 + $0x150] sm:$0xff] }
   0x5   :  { %64 = vmatpush.msra.mxu0 %v320_v5  ;;  %v318_v11 = vld [vmem:[%s752_s1 + $0xe0] sm:$0xff]  ;;  %v317_v14 = vld [vmem:[%s752_s1 + $0xd8] sm:$0xff]  ;;  %v316_v17 = vld [vmem:[%s752_s1 + $0xd0] sm:$0xff] }
   0x6   :  { %87 = vmatpush.msra.mxu1 %v42_v7  ;;  %130 = vmatpush.msra.mxu2 %v335_v6  ;;  %v40_v12 = vld [vmem:[%s752_s1 + $0x60] sm:$0xff]  ;;  %v39_v15 = vld [vmem:[%s752_s1 + $0x58] sm:$0xff]  ;;  %v38_v18 = vld [vmem:[%s752_s1 + $0x50] sm:$0xff] }
   0x7   :  { %65 = vmatpush.msra.mxu0 %v319_v8  ;;  %v331_v19 = vld [vmem:[%s752_s1 + $0x148] sm:$0xff]  ;;  %v330_v22 = vld [vmem:[%s752_s1 + $0x140] sm:$0xff]  ;;  %v329_v25 = vld [vmem:[%s752_s1 + $0x138] sm:$0xff] }
   0x8   :  { %88 = vmatpush.msra.mxu1 %v41_v9  ;;  %131 = vmatpush.msra.mxu2 %v334_v10  ;;  %v315_v20 = vld [vmem:[%s752_s1 + $0xc8] sm:$0xff]  ;;  %v314_v23 = vld [vmem:[%s752_s1 + $0xc0] sm:$0xff]  ;;  %v313_v26 = vld [vmem:[%s752_s1 + $0xb8] sm:$0xff] }
   0x9   :  { %66 = vmatpush.msra.mxu0 %v318_v11  ;;  %v37_v21 = vld [vmem:[%s752_s1 + $0x48] sm:$0xff]  ;;  %v36_v24 = vld [vmem:[%s752_s1 + $0x40] sm:$0xff]  ;;  %v35_v28 = vld [vmem:[%s752_s1 + $0x38] sm:$0xff] }
   0xa   :  { %89 = vmatpush.msra.mxu1 %v40_v12  ;;  %132 = vmatpush.msra.mxu2 %v333_v13  ;;  %v517_v27 = vld [vmem:[%s753_s0] sm:$0xff]  ;;  %v525_v29 = vld [vmem:[%s753_s0 + $0x8] sm:$0xff]  ;;  %v328_v30 = vld [vmem:[%s752_s1 + $0x130] sm:$0xff] }
   0xb   :  { %67 = vmatpush.msra.mxu0 %v317_v14  ;;  %24 = vst [vmem:[#allocation2 + $0x1] sm:$0xff] %v517_v27  ;;  %v312_v31 = vld [vmem:[%s752_s1 + $0xb0] sm:$0xff]  ;;  %v353_v32 = vld [vmem:[%s754_s3 + $0xf8] sm:$0xff]  ;;  %v327_v35 = vld [vmem:[%s752_s1 + $0x128] sm:$0xff] }
   0xc   :  { %90 = vmatpush.msra.mxu1 %v39_v15  ;;  %133 = vmatpush.msra.mxu2 %v332_v16  ;;  %25 = vst [vmem:[#allocation2 + $0x9] sm:$0xff] %v525_v29  ;;  %v34_v33 = vld [vmem:[%s752_s1 + $0x30] sm:$0xff]  ;;  %v311_v36 = vld [vmem:[%s752_s1 + $0xa8] sm:$0xff]  ;;  %v326_v39 = vld [vmem:[%s752_s1 + $0x120] sm:$0xff] }
   0xd   :  { %68 = vmatpush.msra.mxu0 %v316_v17  ;;  %v352_v34 = vld [vmem:[%s754_s3 + $0xf0] sm:$0xff]  ;;  %200 = vmatpush.msra.mxu3 %v353_v32  ;;  %v33_v37 = vld [vmem:[%s752_s1 + $0x28] sm:$0xff]  ;;  %v310_v40 = vld [vmem:[%s752_s1 + $0xa0] sm:$0xff] }
   0xe   :  { %91 = vmatpush.msra.mxu1 %v38_v18  ;;  %134 = vmatpush.msra.mxu2 %v331_v19  ;;  %v351_v38 = vld [vmem:[%s754_s3 + $0xe8] sm:$0xff]  ;;  %v32_v41 = vld [vmem:[%s752_s1 + $0x20] sm:$0xff]  ;;  %v325_v43 = vld [vmem:[%s752_s1 + $0x118] sm:$0xff] }
   0xf   :  { %69 = vmatpush.msra.mxu0 %v315_v20  ;;  %201 = vmatpush.msra.mxu3 %v352_v34  ;;  %v350_v42 = vld [vmem:[%s754_s3 + $0xe0] sm:$0xff]  ;;  %v309_v44 = vld [vmem:[%s752_s1 + $0x98] sm:$0xff]  ;;  %v324_v47 = vld [vmem:[%s752_s1 + $0x110] sm:$0xff] }
  0x10   :  { %92 = vmatpush.msra.mxu1 %v37_v21  ;;  %135 = vmatpush.msra.mxu2 %v330_v22  ;;  %v31_v45 = vld [vmem:[%s752_s1 + $0x18] sm:$0xff]  ;;  %v308_v48 = vld [vmem:[%s752_s1 + $0x90] sm:$0xff]  ;;  %v323_v51 = vld [vmem:[%s752_s1 + $0x108] sm:$0xff] }
  0x11   :  { %70 = vmatpush.msra.mxu0 %v314_v23  ;;  %202 = vmatpush.msra.mxu3 %v351_v38  ;;  %v349_v46 = vld [vmem:[%s754_s3 + $0xd8] sm:$0xff]  ;;  %v30_v49 = vld [vmem:[%s752_s1 + $0x10] sm:$0xff]  ;;  %v307_v52 = vld [vmem:[%s752_s1 + $0x88] sm:$0xff] }
  0x12   :  { %93 = vmatpush.msra.mxu1 %v36_v24  ;;  %136 = vmatpush.msra.mxu2 %v329_v25  ;;  %v348_v50 = vld [vmem:[%s754_s3 + $0xd0] sm:$0xff]  ;;  %v29_v53 = vld [vmem:[%s752_s1 + $0x8] sm:$0xff]  ;;  %v322_v55 = vld [vmem:[%s752_s1 + $0x100] sm:$0xff] }
  0x13   :  { %71 = vmatpush.msra.mxu0 %v313_v26  ;;  %203 = vmatpush.msra.mxu3 %v350_v42  ;;  %v347_v54 = vld [vmem:[%s754_s3 + $0xc8] sm:$0xff]  ;;  %v306_v56 = vld [vmem:[%s752_s1 + $0x80] sm:$0xff]  ;;  %v180_v61 = vld [vmem:[%s754_s3 + $0x78] sm:$0xff] }
  0x14   :  { %94 = vmatpush.msra.mxu1 %v35_v28  ;;  %137 = vmatpush.msra.mxu2 %v328_v30  ;;  %v109_v57 = vld [vmem:[#allocation2 + $0x2] sm:$0xff]  ;;  %v369_v62 = vld [vmem:[%s754_s3 + $0x178] sm:$0xff]  ;;  %v179_v0 = vld [vmem:[%s754_s3 + $0x70] sm:$0xff] }
  0x15   :  { %72 = vmatpush.msra.mxu0 %v312_v31  ;;  %204 = vmatpush.msra.mxu3 %v349_v46  ;;  %v28_v58 = vld [vmem:[%s752_s1] sm:$0xff]  ;;  %v345_v63 = vld [vmem:[%s754_s3 + $0xb8] sm:$0xff]  ;;  %v368_v1 = vld [vmem:[%s754_s3 + $0x170] sm:$0xff] }
  0x16   :  { %95 = vmatpush.msra.mxu1 %v34_v33  ;;  %138 = vmatpush.msra.mxu2 %v327_v35  ;;  %v26_v59 = vld [vmem:[#allocation2] sm:$0xff]  ;;  %v344_v2 = vld [vmem:[%s754_s3 + $0xb0] sm:$0xff]  ;;  %v178_v3 = vld [vmem:[%s754_s3 + $0x68] sm:$0xff] }
  0x17   :  { %73 = vmatpush.msra.mxu0 %v311_v36  ;;  %205 = vmatpush.msra.mxu3 %v348_v50  ;;  %v346_v60 = vld [vmem:[%s754_s3 + $0xc0] sm:$0xff]  ;;  %v367_v4 = vld [vmem:[%s754_s3 + $0x168] sm:$0xff]  ;;  %v176_v10 = vld [vmem:[%s754_s3 + $0x58] sm:$0xff] }
  0x18   :  { %96 = vmatpush.msra.mxu1 %v33_v37  ;;  %139 = vmatpush.msra.mxu2 %v326_v39  ;;  %v110_v5 = vld [vmem:[#allocation2 + $0xa] sm:$0xff]  ;;  %v177_v8 = vld [vmem:[%s754_s3 + $0x60] sm:$0xff]  ;;  %v341_v11 = vld [vmem:[%s754_s3 + $0x98] sm:$0xff] }
  0x19   :  { %74 = vmatpush.msra.mxu0 %v310_v40  ;;  %206 = vmatpush.msra.mxu3 %v347_v54  ;;  %v343_v6 = vld [vmem:[%s754_s3 + $0xa8] sm:$0xff]  ;;  %v342_v9 = vld [vmem:[%s754_s3 + $0xa0] sm:$0xff]  ;;  %v175_v12 = vld [vmem:[%s754_s3 + $0x50] sm:$0xff] }
  0x1a   :  { %97 = vmatpush.msra.mxu1 %v32_v41  ;;  %140 = vmatpush.msra.mxu2 %v325_v43  ;;  %v27_v7 = vld [vmem:[#allocation2 + $0x8] sm:$0xff]  ;;  %v340_v13 = vld [vmem:[%s754_s3 + $0x90] sm:$0xff]  ;;  %v338_v16 = vld [vmem:[%s754_s3 + $0x80] sm:$0xff] }
  0x1b   :  { %75 = vmatpush.msra.mxu0 %v309_v44  ;;  %207 = vmatpush.msra.mxu3 %v346_v60  ;;  %v174_v14 = vld [vmem:[%s754_s3 + $0x48] sm:$0xff]  ;;  %v173_v17 = vld [vmem:[%s754_s3 + $0x40] sm:$0xff]  ;;  %v172_v19 = vld [vmem:[%s754_s3 + $0x38] sm:$0xff] }
  0x1c   :  { %98 = vmatpush.msra.mxu1 %v31_v45  ;;  %141 = vmatpush.msra.mxu2 %v324_v47  ;;  %v339_v15 = vld [vmem:[%s754_s3 + $0x88] sm:$0xff]  ;;  %v366_v18 = vld [vmem:[%s754_s3 + $0x160] sm:$0xff]  ;;  %v365_v20 = vld [vmem:[%s754_s3 + $0x158] sm:$0xff] }
  0x1d   :  { %76 = vmatpush.msra.mxu0 %v308_v48  ;;  %208 = vmatpush.msra.mxu3 %v345_v63  ;;  %v171_v21 = vld [vmem:[%s754_s3 + $0x30] sm:$0xff]  ;;  %v170_v23 = vld [vmem:[%s754_s3 + $0x28] sm:$0xff]  ;;  %v169_v25 = vld [vmem:[%s754_s3 + $0x20] sm:$0xff] }
  0x1e   :  { %99 = vmatpush.msra.mxu1 %v30_v49  ;;  %142 = vmatpush.msra.mxu2 %v323_v51  ;;  %v364_v22 = vld [vmem:[%s754_s3 + $0x150] sm:$0xff]  ;;  %v363_v24 = vld [vmem:[%s754_s3 + $0x148] sm:$0xff]  ;;  %v362_v26 = vld [vmem:[%s754_s3 + $0x140] sm:$0xff] }
  0x1f   :  { %77 = vmatpush.msra.mxu0 %v307_v52  ;;  %209 = vmatpush.msra.mxu3 %v344_v2  ;;  %v168_v28 = vld [vmem:[%s754_s3 + $0x18] sm:$0xff]  ;;  %v167_v31 = vld [vmem:[%s754_s3 + $0x10] sm:$0xff]  ;;  %v166_v33 = vld [vmem:[%s754_s3 + $0x8] sm:$0xff] }
  0x20   :  { %100 = vmatpush.msra.mxu1 %v29_v53  ;;  %143 = vmatpush.msra.mxu2 %v322_v55  ;;  %v361_v30 = vld [vmem:[%s754_s3 + $0x138] sm:$0xff]  ;;  %v360_v32 = vld [vmem:[%s754_s3 + $0x130] sm:$0xff]  ;;  %v359_v34 = vld [vmem:[%s754_s3 + $0x128] sm:$0xff] }
  0x21   :  { %78 = vmatpush.msra.mxu0 %v306_v56  ;;  %144 = vmatmul.f32.vlgmr.msra.gmra.mxu2 %v109_v57  ;;  %v165_v35 = vld [vmem:[%s754_s3] sm:$0xff]  ;;  %v357_v37 = vld [vmem:[%s754_s3 + $0x118] sm:$0xff]  ;;  %v356_v38 = vld [vmem:[%s754_s3 + $0x110] sm:$0xff] }
  0x22   :  { %101 = vmatpush.msra.mxu1 %v28_v58  ;;  %79 = vmatmul.f32.vlgmr.msra.gmra.mxu0 %v517_v27  ;;  %v358_v36 = vld [vmem:[%s754_s3 + $0x120] sm:$0xff]  ;;  %v355_v39 = vld [vmem:[%s754_s3 + $0x108] sm:$0xff] }
  0x23   :  { %102 = vmatmul.f32.vlgmr.msra.gmra.mxu1 %v26_v59  ;;  %223 = vmatpush.msrb.mxu0 %v180_v61  ;;  %v354_v40 = vld [vmem:[%s754_s3 + $0x100] sm:$0xff] }
  0x24   :  { %370 = vmatpush.msrb.mxu2 %v180_v61  ;;  %265 = vmatpush.msrb.mxu1 %v369_v62  ;;  %v403_v44 = vld [vmem:[%s755_s2] ss:$0 sm:$0xff] }
  0x25   :  { %224 = vmatpush.msrb.mxu0 %v179_v0  ;;  %210 = vmatpush.msra.mxu3 %v343_v6 }
  0x26   :  { %371 = vmatpush.msrb.mxu2 %v179_v0  ;;  %266 = vmatpush.msrb.mxu1 %v368_v1  ;;  %v404_v0 = vld [vmem:[%s756_s4] ss:$0 sm:$0xff] }
  0x27   :  { %225 = vmatpush.msrb.mxu0 %v178_v3  ;;  %211 = vmatpush.msra.mxu3 %v342_v9 }
  0x28   :  { %372 = vmatpush.msrb.mxu2 %v178_v3  ;;  %267 = vmatpush.msrb.mxu1 %v367_v4 }
  0x29   :  { %147 = vmatmul.f32.gmra.mxu2 %v110_v5  ;;  %226 = vmatpush.msrb.mxu0 %v177_v8 }
  0x2a   :  { %82 = vmatmul.f32.gmra.mxu0 %v525_v29  ;;  %373 = vmatpush.msrb.mxu2 %v177_v8 }
  0x2b   :  { %105 = vmatmul.f32.gmra.mxu1 %v27_v7  ;;  %227 = vmatpush.msrb.mxu0 %v176_v10 }
  0x2c   :  { %212 = vmatpush.msra.mxu3 %v341_v11  ;;  %374 = vmatpush.msrb.mxu2 %v176_v10 }
  0x2d   :  { %228 = vmatpush.msrb.mxu0 %v175_v12  ;;  %268 = vmatpush.msrb.mxu1 %v366_v18 }
  0x2e   :  { %213 = vmatpush.msra.mxu3 %v340_v13  ;;  %375 = vmatpush.msrb.mxu2 %v175_v12 }
  0x2f   :  { %229 = vmatpush.msrb.mxu0 %v174_v14  ;;  %269 = vmatpush.msrb.mxu1 %v365_v20 }
  0x30   :  { %214 = vmatpush.msra.mxu3 %v339_v15  ;;  %376 = vmatpush.msrb.mxu2 %v174_v14 }
  0x31   :  { %230 = vmatpush.msrb.mxu0 %v173_v17  ;;  %270 = vmatpush.msrb.mxu1 %v364_v22 }
  0x32   :  { %215 = vmatpush.msra.mxu3 %v338_v16  ;;  %377 = vmatpush.msrb.mxu2 %v173_v17 }
  0x33   :  { %231 = vmatpush.msrb.mxu0 %v172_v19  ;;  %271 = vmatpush.msrb.mxu1 %v363_v24 }
  0x34   :  { %386 = vmatpush.msrb.mxu3 %v369_v62  ;;  %378 = vmatpush.msrb.mxu2 %v172_v19 }
  0x35   :  { %232 = vmatpush.msrb.mxu0 %v171_v21  ;;  %272 = vmatpush.msrb.mxu1 %v362_v26 }
  0x36   :  { %387 = vmatpush.msrb.mxu3 %v368_v1  ;;  %379 = vmatpush.msrb.mxu2 %v171_v21 }
  0x37   :  { %233 = vmatpush.msrb.mxu0 %v170_v23  ;;  %273 = vmatpush.msrb.mxu1 %v361_v30 }
  0x38   :  { %388 = vmatpush.msrb.mxu3 %v367_v4  ;;  %380 = vmatpush.msrb.mxu2 %v170_v23 }
  0x39   :  { %234 = vmatpush.msrb.mxu0 %v169_v25  ;;  %274 = vmatpush.msrb.mxu1 %v360_v32 }
  0x3a   :  { %389 = vmatpush.msrb.mxu3 %v366_v18  ;;  %381 = vmatpush.msrb.mxu2 %v169_v25 }
  0x3b   :  { %235 = vmatpush.msrb.mxu0 %v168_v28  ;;  %275 = vmatpush.msrb.mxu1 %v359_v34 }
  0x3c   :  { %390 = vmatpush.msrb.mxu3 %v365_v20  ;;  %382 = vmatpush.msrb.mxu2 %v168_v28 }
  0x3d   :  { %236 = vmatpush.msrb.mxu0 %v167_v31  ;;  %276 = vmatpush.msrb.mxu1 %v358_v36 }
  0x3e   :  { %391 = vmatpush.msrb.mxu3 %v364_v22  ;;  %383 = vmatpush.msrb.mxu2 %v167_v31 }
  0x3f   :  { %237 = vmatpush.msrb.mxu0 %v166_v33  ;;  %277 = vmatpush.msrb.mxu1 %v357_v37 }
  0x40   :  { %392 = vmatpush.msrb.mxu3 %v363_v24  ;;  %384 = vmatpush.msrb.mxu2 %v166_v33 }
  0x41   :  { %238 = vmatpush.msrb.mxu0 %v165_v35  ;;  %278 = vmatpush.msrb.mxu1 %v356_v38 }
  0x42   :  { %393 = vmatpush.msrb.mxu3 %v362_v26  ;;  %385 = vmatpush.msrb.mxu2 %v165_v35 }
  0x43   :  { %279 = vmatpush.msrb.mxu1 %v355_v39 }
  0x44   :  { %394 = vmatpush.msrb.mxu3 %v361_v30 }
  0x45   :  { %280 = vmatpush.msrb.mxu1 %v354_v40 }
  0x46   :  { %395 = vmatpush.msrb.mxu3 %v360_v32 }
  0x48   :  { %396 = vmatpush.msrb.mxu3 %v359_v34 }
  0x4a   :  { %397 = vmatpush.msrb.mxu3 %v358_v36 }
  0x4c   :  { %398 = vmatpush.msrb.mxu3 %v357_v37 }
  0x4e   :  { %399 = vmatpush.msrb.mxu3 %v356_v38 }
  0x50   :  { %400 = vmatpush.msrb.mxu3 %v355_v39 }
  0x52   :  { %401 = vmatpush.msrb.mxu3 %v354_v40 }
  0x9f   :  { %v80_v41 = vpop.f32.mrf.mxu0 }
  0xa0   :  { %v103_v42 = vpop.f32.mrf.mxu1 }
  0xa1   :  { %v104_v43 = vadd.f32 %v103_v42, %v80_v41 }
  0xa4   :  { %v145_v45 = vpop.f32.mrf.mxu2 }
  0xa5   :  { %v151_v46 = vadd.f32 %v145_v45, %v104_v43 }
  0xa7   :  { %v157_v47 = vadd.f32 %v403_v44, %v151_v46  ;;  %v83_v48 = vpop.f32.mrf.mxu0 }
  0xa8   :  { %v106_v49 = vpop.f32.mrf.mxu1 }
  0xa9   :  { %v159_v50 = vmax.f32 %v157_v47, 0.0  ;;  %v107_v51 = vadd.f32 %v106_v49, %v83_v48 }
  0xab   :  { %161 = vst [vmem:[#allocation2 + $0x1] sm:$0xff] %v159_v50  ;;  %216 = vmatmul.f32.vlgmr.msra.gmra.mxu3 %v159_v50 }
  0xac   :  { %v148_v52 = vpop.f32.mrf.mxu2 }
  0xad   :  { %v152_v53 = vadd.f32 %v148_v52, %v107_v51 }
  0xaf   :  { %v158_v54 = vadd.f32 %v403_v44, %v152_v53 }
  0xb1   :  { %v160_v55 = vmax.f32 %v158_v54, 0.0 }
  0xb2   :  { %v163_v56 = vld [vmem:[#allocation2] sm:$0xff] }
  0xb3   :  { %162 = vst [vmem:[#allocation2 + $0x9] sm:$0xff] %v160_v55  ;;  %239 = vmatmul.f32.vlgmr.msrb.gmra.mxu0 %v163_v56  ;;  %219 = vmatmul.f32.gmra.mxu3 %v160_v55 }
  0xba   :  { %v164_v57 = vld [vmem:[#allocation2 + $0x8] sm:$0xff] }
  0xbb   :  { %v246_v58 = vld [vmem:[#allocation2 + $0x2] sm:$0xff]  ;;  %v247_v59 = vld [vmem:[#allocation2 + $0xa] sm:$0xff]  ;;  %242 = vmatmul.f32.vlgmr.msrb.gmra.mxu2 %v164_v57 }
  0xbc   :  { %281 = vmatmul.f32.vlgmr.msrb.gmra.mxu1 %v246_v58  ;;  %284 = vmatmul.f32.vlgmr.msrb.gmra.mxu3 %v247_v59 }
 0x12e   :  { %v217_v60 = vpop.f32.mrf.mxu3 }
 0x130   :  { %v240_v61 = vpop.f32.mrf.mxu0 }
 0x131   :  { %v241_v63 = vadd.f32 %v240_v61, %v217_v60 }
 0x136   :  { %v220_v62 = vpop.f32.mrf.mxu3 }
 0x139   :  { %v282_v1 = vpop.f32.mrf.mxu1 }
 0x13a   :  { %v288_v2 = vadd.f32 %v282_v1, %v241_v63 }
 0x13c   :  { %v294_v3 = vadd.f32 %v404_v0, %v288_v2 }
 0x13e   :  { %v296_v4 = vadd.f32 %v294_v3, %v517_v27  ;;  %v243_v5 = vpop.f32.mrf.mxu2 }
 0x13f   :  { %v244_v7 = vadd.f32 %v243_v5, %v220_v62  ;;  %v285_v8 = vpop.f32.mrf.mxu3 }
 0x140   :  { %v298_v6 = vmax.f32 %v296_v4, 0.0 }
 0x141   :  { %v289_v9 = vadd.f32 %v285_v8, %v244_v7 }
 0x142   :  { %300 = vst [vmem:[%s757_s5] sm:$0xff] %v298_v6 }
 0x143   :  { %v295_v10 = vadd.f32 %v404_v0, %v289_v9 }
 0x145   :  { %v297_v11 = vadd.f32 %v295_v10, %v525_v29 }
 0x147   :  { %v299_v12 = vmax.f32 %v297_v11, 0.0 }
 0x149   :  { %301 = vst [vmem:[%s757_s5 + $0x8] sm:$0xff] %v299_v12 }

</bundles_post_ra>
